<compile_context>
chip_gen: v7x
topology: tpu7x:2x2x1
jax: 0.10.0
libtpu: 0.0.40
codegen_flags: <defaults>
</compile_context>

<pallas_src>
import functools

import jax
import jax.numpy as jnp
from jax.experimental import pallas as pl
from jax.experimental.pallas import tpu as pltpu

LANE = 128


def _round_up(x, m):
    return ((x + m - 1) // m) * m


# --------------------------------------------------------------------------
# Kernel
# --------------------------------------------------------------------------
def _make_kernel(n_middle, inv_n):
    """One batch block: fused (all-MC-samples) MLP, single lane-dense store."""

    def kernel(x_ref, *refs):
        out_ref = refs[-1]

        # Layer 1: one wide matmul covers every MC sample (weights are
        # concatenated along the output dim), one wide bias+ReLU sweep.
        h = jnp.dot(x_ref[...], refs[0][...],
                    preferred_element_type=jnp.float32) + refs[1][...]
        h = jnp.maximum(h, 0.0)

        # Middle shared layers: block-diagonal (per-sample) weights -> one
        # wide matmul per layer, no in-kernel slicing or per-sample loop.
        idx = 2
        for _ in range(n_middle):
            h = jnp.dot(h, refs[idx][...],
                        preferred_element_type=jnp.float32) + refs[idx + 1][...]
            h = jnp.maximum(h, 0.0)
            idx += 2

        # Head: K-stacked weights -> the sum over MC samples is the
        # contraction itself.  Multiply by precomputed 1/n and add the mean
        # head bias once (hoisted out of any sample loop).
        out = jnp.dot(h, refs[idx][...], preferred_element_type=jnp.float32)
        out_ref[...] = out * inv_n + refs[idx + 1][...]

    return kernel


# --------------------------------------------------------------------------
# Wrapper
# --------------------------------------------------------------------------
def prepare_kernel_params(sampled_weights, sampled_biases):
    """Build kernel-ready parameter tensors from per-sample weights.

    Args:
      sampled_weights: list of (S, in_i, out_i) arrays (kernel layout, already
        transposed at init time); last entry is the selected task head.
      sampled_biases: list of (S, out_i) arrays.
    Returns:
      (params, meta): flat list of 2-D f32 arrays for the kernel + metadata.
    """
    S = sampled_weights[0].shape[0]
    n_shared = len(sampled_weights) - 1
    params = []

    # Layer 1: concatenate samples along the output dim -> (d_in, S*H1).
    w1 = sampled_weights[0].astype(jnp.float32)           # (S, d_in, H1)
    b1 = sampled_biases[0].astype(jnp.float32)            # (S, H1)
    d_in, h1 = w1.shape[1], w1.shape[2]
    params.append(jnp.transpose(w1, (1, 0, 2)).reshape(d_in, S * h1))
    params.append(b1.reshape(1, S * h1))
    prev = h1

    # Middle shared layers: block-diagonal across samples.
    for i in range(1, n_shared):
        w = sampled_weights[i].astype(jnp.float32)         # (S, prev, Hi)
        b = sampled_biases[i].astype(jnp.float32)          # (S, Hi)
        hi = w.shape[2]
        wbd = jnp.zeros((S * prev, S * hi), jnp.float32)
        for s in range(S):
            wbd = wbd.at[s * prev:(s + 1) * prev, s * hi:(s + 1) * hi].set(w[s])
        params.append(wbd)
        params.append(b.reshape(1, S * hi))
        prev = hi

    # Head: stack along K -> (S*prev, head_p); pad out dim to one lane width
    # so the single output store is lane-dense.  Mean bias hoisted.
    wh = sampled_weights[-1].astype(jnp.float32)           # (S, prev, head)
    bh = sampled_biases[-1].astype(jnp.float32)            # (S, head)
    head = wh.shape[2]
    head_p = _round_up(head, LANE)
    wh_stack = jnp.zeros((S * prev, head_p), jnp.float32)
    wh_stack = wh_stack.at[:, :head].set(wh.reshape(S * prev, head))
    bh_mean = jnp.zeros((1, head_p), jnp.float32)
    bh_mean = bh_mean.at[0, :head].set(jnp.mean(bh, axis=0))
    params.append(wh_stack)
    params.append(bh_mean)

    meta = dict(n_samples=S, n_middle=n_shared - 1, d_in=d_in,
                head_size=head, head_p=head_p)
    return params, meta


def vcl_multihead_mlp_forward(x, kernel_params, meta):
    """Mean-over-MC-samples logits for one batch. x: (B, d_in) f32."""
    batch, d_in = x.shape
    assert d_in == meta["d_in"]
    head_p = meta["head_p"]
    inv_n = 1.0 / float(meta["n_samples"])

    # Batch blocking: 8-aligned, large blocks (sub-MB DMA tiles waste the HBM
    # roofline), and >= 2 grid steps whenever we split at all so the
    # "parallel" axis can be sharded across the 2 v7x TensorCores.
    max_block = 1024
    batch8 = _round_up(batch, 8)
    if batch8 <= max_block:
        batch_block = batch8
    else:
        batch_block = min(max_block, _round_up((batch8 + 1) // 2, 8))
    batch_p = _round_up(batch8, batch_block)

    x = x.astype(jnp.float32)
    if batch_p != batch:
        x = jnp.zeros((batch_p, d_in), jnp.float32).at[:batch].set(x)
    # Note: d_in is NOT padded — the x block's last dim equals the full array
    # dim (exempt from the 128 rule); no padded-x HBM copy is materialized.

    in_specs = [pl.BlockSpec((batch_block, d_in), lambda i: (i, 0))]
    for p in kernel_params:
        in_specs.append(pl.BlockSpec(p.shape, lambda i: (0, 0)))
    out_spec = pl.BlockSpec((batch_block, head_p), lambda i: (i, 0))

    kernel = _make_kernel(meta["n_middle"], inv_n)

    out_padded = pl.pallas_call(
        kernel,
        out_shape=jax.ShapeDtypeStruct((batch_p, head_p), jnp.float32),
        grid=(batch_p // batch_block,),
        in_specs=in_specs,
        out_specs=out_spec,
        compiler_params=pltpu.CompilerParams(
            dimension_semantics=("parallel",),      # batch blocks independent
            vmem_limit_bytes=48 * 1024 * 1024),     # headroom for big blocks (v5e)
    )(x, *kernel_params)
    return out_padded[:batch, :meta["head_size"]]


def vcl_forward_from_samples(x, sampled_weights, sampled_biases):
    """prep (tiny elementwise/concat glue) + Pallas kernel; jit this."""
    kparams, meta = prepare_kernel_params(sampled_weights, sampled_biases)
    return vcl_multihead_mlp_forward(x, kparams, meta)


# --------------------------------------------------------------------------
# Parameter init + MC sampling (plain-JAX glue, matching MeanFieldLinear)
# --------------------------------------------------------------------------
def init_mean_field_linear(key, in_features, out_features):
    """MeanFieldLinear init; mu/rho stored pre-transposed in (in, out) layout
    so per-forward sampling never transposes the sampled weight stacks."""
    k_w, k_b = jax.random.split(key)
    weight_mu = 0.1 * jax.random.normal(k_w, (in_features, out_features), jnp.float32)
    weight_rho = jnp.full((in_features, out_features), -6.0, jnp.float32)
    bias_mu = 0.1 * jax.random.normal(k_b, (out_features,), jnp.float32)
    bias_rho = jnp.full((out_features,), -6.0, jnp.float32)
    return dict(weight_mu=weight_mu, weight_rho=weight_rho,
                bias_mu=bias_mu, bias_rho=bias_rho)


def sample_layer(key, params, n_samples):
    """Draw n_samples of (W, b) with W = mu + exp(0.5*rho)*eps (mean-field)."""
    k_w, k_b = jax.random.split(key)
    wm, wr = params["weight_mu"], params["weight_rho"]
    bm, br = params["bias_mu"], params["bias_rho"]
    eps_w = jax.random.normal(k_w, (n_samples,) + wm.shape, jnp.float32)
    eps_b = jax.random.normal(k_b, (n_samples,) + bm.shape, jnp.float32)
    w = wm[None] + jnp.exp(0.5 * wr)[None] * eps_w             # (S, in, out)
    b = bm[None] + jnp.exp(0.5 * br)[None] * eps_b             # (S, out)
    return w, b


def reference_forward(x, sampled_weights, sampled_biases):
    """Pure-JAX reference of the same computation (per-sample loop)."""
    S = sampled_weights[0].shape[0]
    acc = jnp.zeros((x.shape[0], sampled_weights[-1].shape[2]), jnp.float32)
    for s in range(S):
        h = x
        for w, b in zip(sampled_weights[:-1], sampled_biases[:-1]):
            h = jnp.maximum(h @ w[s] + b[s], 0.0)
        acc = acc + (h @ sampled_weights[-1][s] + sampled_biases[-1][s])
    return acc / S


# --------------------------------------------------------------------------
if __name__ == "__main__":
    # Small config consistent with the module's forward:
    batch = 8
    input_size = 32
    hidden_sizes = [32, 32]
    num_tasks = 3
    head_size = 2
    task_idx = 0
    n_samples = 3

    root = jax.random.PRNGKey(0)
    k_x, k_params, k_sample = jax.random.split(root, 3)

    x = jax.random.normal(k_x, (batch, input_size), jnp.float32)

    # Build parameters for shared layers and all heads (deterministic init).
    layer_keys = jax.random.split(k_params, len(hidden_sizes) + num_tasks)
    shared_params = []
    prev = input_size
    for i, h in enumerate(hidden_sizes):
        shared_params.append(init_mean_field_linear(layer_keys[i], prev, h))
        prev = h
    head_params = [
        init_mean_field_linear(layer_keys[len(hidden_sizes) + t], prev, head_size)
        for t in range(num_tasks)
    ]

    # Sample MC weights for the shared layers + selected task head (glue).
    sample_keys = jax.random.split(k_sample, len(shared_params) + 1)
    sampled_weights, sampled_biases = [], []
    for i, p in enumerate(shared_params):
        w, b = sample_layer(sample_keys[i], p, n_samples)
        sampled_weights.append(w)
        sampled_biases.append(b)
    wh, bh = sample_layer(sample_keys[-1], head_params[task_idx], n_samples)
    sampled_weights.append(wh)
    sampled_biases.append(bh)

    fwd = jax.jit(vcl_forward_from_samples)
    out = fwd(x, sampled_weights, sampled_biases)
    out = jax.block_until_ready(out)

    ref = reference_forward(x, sampled_weights, sampled_biases)
    assert out.shape == (batch, head_size)
    assert jnp.allclose(out, ref, atol=1e-4, rtol=1e-4), "mismatch vs reference"

    print("KERNEL_OK")
</pallas_src>

<mosaic_0001>
module attributes {stable_mosaic.version = 11 : i64} {
  func.func @kernel(%arg0: i32, %arg1: memref<8x32xf32, #tpu.memory_space<vmem>>, %arg2: memref<32x96xf32, #tpu.memory_space<vmem>>, %arg3: memref<1x96xf32, #tpu.memory_space<vmem>>, %arg4: memref<96x96xf32, #tpu.memory_space<vmem>>, %arg5: memref<1x96xf32, #tpu.memory_space<vmem>>, %arg6: memref<96x128xf32, #tpu.memory_space<vmem>>, %arg7: memref<1x128xf32, #tpu.memory_space<vmem>>, %arg8: memref<8x128xf32, #tpu.memory_space<vmem>>) attributes {dimension_semantics = [#tpu.dimension_semantics<parallel>], iteration_bounds = array<i64: 1>, scalar_prefetch = 0 : i64, scratch_operands = 0 : i64, tpu.core_type = #tpu.core_type<tc>, window_params = [{transform_indices = @transform_0, window_bounds = array<i64: 8, 32>}, {pipeline_mode = #tpu.pipeline_mode<synchronous>, transform_indices = @transform_1, window_bounds = array<i64: 32, 96>}, {pipeline_mode = #tpu.pipeline_mode<synchronous>, transform_indices = @transform_2, window_bounds = array<i64: 1, 96>}, {pipeline_mode = #tpu.pipeline_mode<synchronous>, transform_indices = @transform_3, window_bounds = array<i64: 96, 96>}, {pipeline_mode = #tpu.pipeline_mode<synchronous>, transform_indices = @transform_4, window_bounds = array<i64: 1, 96>}, {pipeline_mode = #tpu.pipeline_mode<synchronous>, transform_indices = @transform_5, window_bounds = array<i64: 96, 128>}, {pipeline_mode = #tpu.pipeline_mode<synchronous>, transform_indices = @transform_6, window_bounds = array<i64: 1, 128>}, {transform_indices = @transform_7, window_bounds = array<i64: 8, 128>}]} {
    %c0 = arith.constant 0 : index
    %c0_0 = arith.constant 0 : index
    %0 = vector.load %arg1[%c0, %c0_0] : memref<8x32xf32, #tpu.memory_space<vmem>>, vector<8x32xf32>
    %c0_1 = arith.constant 0 : index
    %c0_2 = arith.constant 0 : index
    %1 = vector.load %arg2[%c0_1, %c0_2] : memref<32x96xf32, #tpu.memory_space<vmem>>, vector<32x96xf32>
    %cst = arith.constant dense<0.000000e+00> : vector<8x96xf32>
    %2 = tpu.matmul %0, %1, %cst {dimension_numbers = #tpu.dot_dimension_numbers<[1], [0], [0], [1], [0, 0, 1, 1], [], []>} : vector<8x32xf32>, vector<32x96xf32>, vector<8x96xf32> -> vector<8x96xf32>
    %c0_3 = arith.constant 0 : index
    %c0_4 = arith.constant 0 : index
    %3 = vector.load %arg3[%c0_3, %c0_4] : memref<1x96xf32, #tpu.memory_space<vmem>>, vector<1x96xf32>
    %4 = vector.broadcast %3 : vector<1x96xf32> to vector<8x96xf32>
    %5 = arith.addf %2, %4 : vector<8x96xf32>
    %cst_5 = arith.constant 0.000000e+00 : f32
    %6 = vector.broadcast %cst_5 : f32 to vector<8x96xf32>
    %7 = arith.maximumf %5, %6 : vector<8x96xf32>
    %c0_6 = arith.constant 0 : index
    %c0_7 = arith.constant 0 : index
    %8 = vector.load %arg4[%c0_6, %c0_7] : memref<96x96xf32, #tpu.memory_space<vmem>>, vector<96x96xf32>
    %cst_8 = arith.constant dense<0.000000e+00> : vector<8x96xf32>
    %9 = tpu.matmul %7, %8, %cst_8 {dimension_numbers = #tpu.dot_dimension_numbers<[1], [0], [0], [1], [0, 0, 1, 1], [], []>} : vector<8x96xf32>, vector<96x96xf32>, vector<8x96xf32> -> vector<8x96xf32>
    %c0_9 = arith.constant 0 : index
    %c0_10 = arith.constant 0 : index
    %10 = vector.load %arg5[%c0_9, %c0_10] : memref<1x96xf32, #tpu.memory_space<vmem>>, vector<1x96xf32>
    %11 = vector.broadcast %10 : vector<1x96xf32> to vector<8x96xf32>
    %12 = arith.addf %9, %11 : vector<8x96xf32>
    %cst_11 = arith.constant 0.000000e+00 : f32
    %13 = vector.broadcast %cst_11 : f32 to vector<8x96xf32>
    %14 = arith.maximumf %12, %13 : vector<8x96xf32>
    %c0_12 = arith.constant 0 : index
    %c0_13 = arith.constant 0 : index
    %15 = vector.load %arg6[%c0_12, %c0_13] : memref<96x128xf32, #tpu.memory_space<vmem>>, vector<96x128xf32>
    %cst_14 = arith.constant dense<0.000000e+00> : vector<8x128xf32>
    %16 = tpu.matmul %14, %15, %cst_14 {dimension_numbers = #tpu.dot_dimension_numbers<[1], [0], [0], [1], [0, 0, 1, 1], [], []>} : vector<8x96xf32>, vector<96x128xf32>, vector<8x128xf32> -> vector<8x128xf32>
    %cst_15 = arith.constant 0.333333343 : f32
    %17 = vector.broadcast %cst_15 : f32 to vector<8x128xf32>
    %18 = arith.mulf %16, %17 : vector<8x128xf32>
    %c0_16 = arith.constant 0 : index
    %c0_17 = arith.constant 0 : index
    %19 = vector.load %arg7[%c0_16, %c0_17] : memref<1x128xf32, #tpu.memory_space<vmem>>, vector<1x128xf32>
    %20 = vector.broadcast %19 : vector<1x128xf32> to vector<8x128xf32>
    %21 = arith.addf %18, %20 : vector<8x128xf32>
    %c0_18 = arith.constant 0 : index
    %c0_19 = arith.constant 0 : index
    %22 = vector.load %arg8[%c0_18, %c0_19] : memref<8x128xf32, #tpu.memory_space<vmem>>, vector<8x128xf32>
    tpu.vector_store %arg8[%c0_18, %c0_19], %21 {strides = array<i32>} : memref<8x128xf32, #tpu.memory_space<vmem>>, vector<8x128xf32>,
    return
  }
  func.func @transform_0(%arg0: i32) -> (i32, i32) {
    %c0_i32 = arith.constant 0 : i32
    %c0_i32_0 = arith.constant 0 : i32
    return %arg0, %c0_i32 : i32, i32
  }
  func.func @transform_1(%arg0: i32) -> (i32, i32) {
    %c0_i32 = arith.constant 0 : i32
    %c0_i32_0 = arith.constant 0 : i32
    %c0_i32_1 = arith.constant 0 : i32
    return %c0_i32, %c0_i32_0 : i32, i32
  }
  func.func @transform_2(%arg0: i32) -> (i32, i32) {
    %c0_i32 = arith.constant 0 : i32
    %c0_i32_0 = arith.constant 0 : i32
    %c0_i32_1 = arith.constant 0 : i32
    return %c0_i32, %c0_i32_0 : i32, i32
  }
  func.func @transform_3(%arg0: i32) -> (i32, i32) {
    %c0_i32 = arith.constant 0 : i32
    %c0_i32_0 = arith.constant 0 : i32
    %c0_i32_1 = arith.constant 0 : i32
    return %c0_i32, %c0_i32_0 : i32, i32
  }
  func.func @transform_4(%arg0: i32) -> (i32, i32) {
    %c0_i32 = arith.constant 0 : i32
    %c0_i32_0 = arith.constant 0 : i32
    %c0_i32_1 = arith.constant 0 : i32
    return %c0_i32, %c0_i32_0 : i32, i32
  }
  func.func @transform_5(%arg0: i32) -> (i32, i32) {
    %c0_i32 = arith.constant 0 : i32
    %c0_i32_0 = arith.constant 0 : i32
    %c0_i32_1 = arith.constant 0 : i32
    return %c0_i32, %c0_i32_0 : i32, i32
  }
  func.func @transform_6(%arg0: i32) -> (i32, i32) {
    %c0_i32 = arith.constant 0 : i32
    %c0_i32_0 = arith.constant 0 : i32
    %c0_i32_1 = arith.constant 0 : i32
    return %c0_i32, %c0_i32_0 : i32, i32
  }
  func.func @transform_7(%arg0: i32) -> (i32, i32) {
    %c0_i32 = arith.constant 0 : i32
    %c0_i32_0 = arith.constant 0 : i32
    return %arg0, %c0_i32 : i32, i32
  }
}

</mosaic_0001>

<bundles_post_ra>
// kernel: vcl_forward_from_samples.1
= control target key start
LH: loop header
LB: loop body
LE: loop exit
PB: predicated region body
PF: predicated region fallthrough
CT: control target
= control target key end

     0   :  { %v453_v0 = vmov 0.0|0.0   ;;  %vm454_vm0 = vmmov 0   ;;  %v455_v4 = vmov 0.0   ;;  %vm38_vm1 = vcmask 261120   ;;  %s612_s1 = inlined_call_operand.vmem [shape: f32[32,96], index: 1, kind: input, shape index: {}]   ;;  %s613_s3 = inlined_call_operand.vmem [shape: f32[96,96], index: 3, kind: input, shape index: {}]   ;;  %s614_s0 = inlined_call_operand.vmem [shape: f32[8,32], index: 0, kind: input, shape index: {}]   ;;  %s615_s5 = inlined_call_operand.vmem [shape: f32[96,128], index: 5, kind: input, shape index: {}]   ;;  %s616_s2 = inlined_call_operand.vmem [shape: f32[1,96], index: 2, kind: input, shape index: {}]   ;;  %s617_s4 = inlined_call_operand.vmem [shape: f32[1,96], index: 4, kind: input, shape index: {}]   ;;  %s618_s6 = inlined_call_operand.vmem [shape: f32[1,128], index: 6, kind: input, shape index: {}]   ;;  %s619_s7 = inlined_call_operand.vmem [shape: f32[8,128], index: 7, kind: output, shape index: {}]  }
   0x1   :  { %408 = vmatprep.subr.bf16.mxu0 %v453_v0  ;;  %v27_v1 = vld [vmem:[%s612_s1] sm:$0xff]  ;;  %v28_v2 = vld [vmem:[%s612_s1 + $0x8] sm:$0xff]  ;;  %v29_v3 = vld [vmem:[%s612_s1 + $0x10] sm:$0xff]  ;;  %351 = vmatprep.mubr.msk.f32.mxu0 %vm454_vm0, %v455_v4  ;;  %vm132_vm2 = vcmask 785408  }
   0x2   :  { %v409_v5 = vpack.c.bf16 %v28_v2, %v27_v1  ;;  %v30_v6 = vld [vmem:[%s612_s1 + $0x18] sm:$0xff]  ;;  %414 = vmatprep.subr.bf16.mxu1 %v453_v0  ;;  %v113_v7 = vld [vmem:[%s613_s3] sm:$0xff]  ;;  %378 = vmatprep.mubr.msk.f32.mxu1 %vm454_vm0, %v455_v4  ;;  %v114_v8 = vld [vmem:[%s613_s3 + $0x8] sm:$0xff] }
   0x3   :  { %v115_v9 = vld [vmem:[%s613_s3 + $0x10] sm:$0xff]  ;;  %v116_v10 = vld [vmem:[%s613_s3 + $0x18] sm:$0xff]  ;;  %v412_v11 = vpack.c.bf16 %v30_v6, %v29_v3  ;;  %v415_v12 = vpack.c.bf16 %v114_v8, %v113_v7  ;;  %v117_v14 = vld [vmem:[%s613_s3 + $0x20] sm:$0xff] }
   0x4   :  { %410 = vmatpush3.bf16.msra.mxu0 %v409_v5  ;;  %v418_v13 = vpack.c.bf16 %v116_v10, %v115_v9  ;;  %v118_v15 = vld [vmem:[%s613_s3 + $0x28] sm:$0xff]  ;;  %v26_v16 = vld [vmem:[%s614_s0] sm:$0xff]  ;;  %v119_v18 = vld [vmem:[%s613_s3 + $0x30] sm:$0xff] }
   0x5   :  { %411 = vmatprep.subr.bf16.mxu0 %v453_v0  ;;  %416 = vmatpush3.bf16.msra.mxu1 %v415_v12  ;;  %v421_v17 = vpack.c.bf16 %v118_v15, %v117_v14  ;;  %v120_v19 = vld [vmem:[%s613_s3 + $0x38] sm:$0xff]  ;;  %v121_v21 = vld [vmem:[%s613_s3 + $0x40] sm:$0xff]  ;;  %v122_v22 = vld [vmem:[%s613_s3 + $0x48] sm:$0xff] }
   0x6   :  { %417 = vmatprep.subr.bf16.mxu1 %v453_v0  ;;  %v424_v20 = vpack.c.bf16 %v120_v19, %v119_v18  ;;  %v427_v23 = vpack.c.bf16 %v122_v22, %v121_v21  ;;  %v123_v24 = vld [vmem:[%s613_s3 + $0x50] sm:$0xff]  ;;  %v124_v25 = vld [vmem:[%s613_s3 + $0x58] sm:$0xff]  ;;  %v207_v27 = vld [vmem:[%s615_s5] sm:$0xff] }
   0x7   :  { %v430_v26 = vpack.c.bf16 %v124_v25, %v123_v24  ;;  %v208_v28 = vld [vmem:[%s615_s5 + $0x8] sm:$0xff]  ;;  %v209_v29 = vld [vmem:[%s615_s5 + $0x10] sm:$0xff]  ;;  %v210_v31 = vld [vmem:[%s615_s5 + $0x18] sm:$0xff] }
   0x8   :  { %413 = vmatpush3.bf16.msra.mxu0 %v412_v11  ;;  %v433_v30 = vpack.c.bf16 %v208_v28, %v207_v27  ;;  %v436_v32 = vpack.c.bf16 %v210_v31, %v209_v29  ;;  %v211_v33 = vld [vmem:[%s615_s5 + $0x20] sm:$0xff]  ;;  %v212_v34 = vld [vmem:[%s615_s5 + $0x28] sm:$0xff]  ;;  %v213_v36 = vld [vmem:[%s615_s5 + $0x30] sm:$0xff] }
   0x9   :  { %432 = vmatprep.subr.bf16.mxu0 %v453_v0  ;;  %419 = vmatpush3.bf16.msra.mxu1 %v418_v13  ;;  %v439_v35 = vpack.c.bf16 %v212_v34, %v211_v33  ;;  %v214_v37 = vld [vmem:[%s615_s5 + $0x38] sm:$0xff]  ;;  %v215_v39 = vld [vmem:[%s615_s5 + $0x40] sm:$0xff]  ;;  %v216_v40 = vld [vmem:[%s615_s5 + $0x48] sm:$0xff] }
   0xa   :  { %420 = vmatprep.subr.bf16.mxu1 %v453_v0  ;;  %v442_v38 = vpack.c.bf16 %v214_v37, %v213_v36  ;;  %v445_v41 = vpack.c.bf16 %v216_v40, %v215_v39  ;;  %v306_v42 = vld [vmem:[%s616_s2] ss:$0 sm:$0xff]  ;;  %v217_v47 = vld [vmem:[%s615_s5 + $0x50] sm:$0xff]  ;;  %v218_v48 = vld [vmem:[%s615_s5 + $0x58] sm:$0xff] }
   0xb   :  { %352 = vmatmul.mubr.msk.f32.vlgmr.msra.gmra.mrb[0].mxu0 %vm38_vm1, %v26_v16  ;;  %v448_v49 = vpack.c.bf16 %v218_v48, %v217_v47  ;;  %v308_v50 = vld [vmem:[%s617_s4] ss:$0 sm:$0xff] }
   0xc   :  { %405 = vmatprep.mubr.msk.f32.mxu0 %vm454_vm0, %v455_v4  ;;  %434 = vmatpush3.bf16.msra.mxu0 %v433_v30  ;;  %v311_v56 = vld [vmem:[%s618_s6] ss:$0 sm:$0xff] }
   0xd   :  { %422 = vmatpush3.bf16.msra.mxu1 %v421_v17  ;;  %435 = vmatprep.subr.bf16.mxu0 %v453_v0 }
   0xe   :  { %423 = vmatprep.subr.bf16.mxu1 %v453_v0 }
  0x10   :  { %437 = vmatpush3.bf16.msra.mxu0 %v436_v32 }
  0x11   :  { %425 = vmatpush3.bf16.msra.mxu1 %v424_v20  ;;  %438 = vmatprep.subr.bf16.mxu0 %v453_v0 }
  0x12   :  { %426 = vmatprep.subr.bf16.mxu1 %v453_v0 }
  0x14   :  { %440 = vmatpush3.bf16.msra.mxu0 %v439_v35 }
  0x15   :  { %428 = vmatpush3.bf16.msra.mxu1 %v427_v23  ;;  %441 = vmatprep.subr.bf16.mxu0 %v453_v0 }
  0x16   :  { %429 = vmatprep.subr.bf16.mxu1 %v453_v0 }
  0x18   :  { %443 = vmatpush3.bf16.msra.mxu0 %v442_v38 }
  0x19   :  { %431 = vmatpush3.bf16.msra.mxu1 %v430_v26  ;;  %444 = vmatprep.subr.bf16.mxu0 %v453_v0 }
  0x1c   :  { %446 = vmatpush3.bf16.msra.mxu0 %v445_v41 }
  0x1d   :  { %447 = vmatprep.subr.bf16.mxu0 %v453_v0 }
  0x20   :  { %449 = vmatpush3.bf16.msra.mxu0 %v448_v49 }
  0xde   :  { %v108_v43 = vpop.f32.mrb[0].mxu0 }
  0xdf   :  { %v109_v44 = vadd.f32 %v306_v42, %v108_v43  ;;  %v353_v45 = vpop.f32.mrb[1].mxu0 }
  0xe1   :  { %v112_v46 = vmax.f32 %v109_v44, 0.0 }
  0xe3   :  { %379 = vmatmul.mubr.msk.f32.vlgmr.msra.gmra.mrb[0].mxu1 %vm132_vm2, %v112_v46 }
 0x1b6   :  { %v202_v51 = vpop.f32.mrb[0].mxu1 }
 0x1b7   :  { %v203_v52 = vadd.f32 %v308_v50, %v202_v51  ;;  %v380_v53 = vpop.f32.mrb[1].mxu1 }
 0x1b9   :  { %v206_v54 = vmax.f32 %v203_v52, 0.0 }
 0x1bb   :  { %406 = vmatmul.mubr.msk.f32.vlgmr.msra.gmra.mrb[2].mxu0 %vm132_vm2, %v206_v54 }
 0x28e   :  { %v288_v55 = vpop.f32.mrb[2].mxu0 }
 0x28f   :  { %v292_v57 = vmul.f32 0.33333334, %v288_v55  ;;  %v407_v58 = vpop.f32.mrb[3].mxu0 }
 0x291   :  { %v300_v59 = vadd.f32 %v311_v56, %v292_v57 }
 0x293   :  { %301 = vst [vmem:[%s619_s7] sm:$0xff] %v300_v59 }

</bundles_post_ra>
